<compile_context>
chip_gen: v5e
topology: v5e:2x2
jax: 0.10.0
libtpu: 0.0.40
codegen_flags: <defaults>
</compile_context>

<pallas_src>
import functools

import numpy as np
import jax
import jax.numpy as jnp
from jax.experimental import pallas as pl
from jax.experimental.pallas import tpu as pltpu


def _pow_gamma(base, gamma):
    """base**gamma for base >= 0 without relying on generic pow lowering."""
    g = float(gamma)
    if g == int(g) and 0 <= int(g) <= 8:
        out = jnp.ones_like(base)
        for _ in range(int(g)):
            out = out * base
        return out
    safe = jnp.maximum(base, jnp.float32(1e-30))
    return jnp.where(base > 0.0, jnp.exp(g * jnp.log(safe)), jnp.zeros_like(base))


def _cb_focal_kernel(x_ref, tgt_ref, w_ref, out_ref, *, gamma, tile_n, n_valid):
    i = pl.program_id(0)

    x = x_ref[...].astype(jnp.float32)        # (TILE_N, C) logits (bf16/f32 in)
    tgt = tgt_ref[...]                        # (TILE_N, 1) int32 labels
    w = w_ref[...].astype(jnp.float32)        # (1, C) per-class weights

    tn, c = x.shape
    cols = jax.lax.broadcasted_iota(jnp.int32, (tn, c), 1)
    onehot = (cols == tgt).astype(jnp.float32)               # (TILE_N, C)

    # Gather target logit / target-class weight via mask + reduce (VPU+XLU).
    x_t = jnp.sum(onehot * x, axis=-1, keepdims=True)        # (TILE_N, 1)
    w_t = jnp.sum(onehot * w, axis=-1, keepdims=True)        # (TILE_N, 1)

    # Numerically stable log-sum-exp for the cross-entropy.
    xmax = jnp.max(x, axis=-1, keepdims=True)
    lse = xmax + jnp.log(jnp.sum(jnp.exp(x - xmax), axis=-1, keepdims=True))

    ce = w_t * (lse - x_t)                    # weighted per-sample CE (>= 0)
    p = jnp.exp(-ce)
    loss = _pow_gamma(1.0 - p, gamma) * ce    # focal modulation

    # Mask rows beyond the true batch size (ragged last tile reads padding).
    rows = i * tile_n + jax.lax.broadcasted_iota(jnp.int32, (tn, 1), 0)
    loss = jnp.where(rows < n_valid, loss, 0.0)

    # Lane-dense, unmasked store of this tile's partial sum.
    out_ref[...] = jnp.full(out_ref.shape, jnp.sum(loss), dtype=out_ref.dtype)


def _per_cls_weights(cls_list):
    beta = 0.9999
    cls = np.asarray(cls_list, dtype=np.float64)
    effective_num = 1.0 - np.power(beta, cls)
    w = (1.0 - beta) / effective_num
    w = w / np.sum(w) * len(cls_list)
    return jnp.asarray(w, dtype=jnp.float32)


def _round_up(x, m):
    return (x + m - 1) // m * m


def _choose_tile_n(n, c, itemsize):
    vmem_budget = 24 * 1024 * 1024                      # headroom under 32 MiB scoped
    max_rows = vmem_budget // (2 * max(1, c * itemsize))  # 2 double-buffered x tiles
    tile = min(512, int(max_rows), _round_up(n, 8))
    return max(8, (tile // 8) * 8)


def class_balanced_focal_loss(x, target, cls_list, gamma=2.0):
    """Pallas implementation of Class_Balanced_FocalLoss.forward."""
    n, c = x.shape
    if x.dtype not in (jnp.float32, jnp.bfloat16):
        x = x.astype(jnp.float32)                       # keep bf16 as bf16 (less DMA)
    tgt = target.astype(jnp.int32).reshape(n, 1)
    w = _per_cls_weights(cls_list).reshape(1, c)

    tile_n = _choose_tile_n(n, c, x.dtype.itemsize)
    num_tiles = int(pl.cdiv(n, tile_n))

    kernel = functools.partial(
        _cb_focal_kernel, gamma=float(gamma), tile_n=tile_n, n_valid=n)

    partials = pl.pallas_call(
        kernel,
        out_shape=jax.ShapeDtypeStruct((num_tiles, 8, 128), jnp.float32),
        grid=(num_tiles,),
        in_specs=[
            pl.BlockSpec((tile_n, c), lambda i: (i, 0)),   # logits tile
            pl.BlockSpec((tile_n, 1), lambda i: (i, 0)),   # labels tile
            pl.BlockSpec((1, c), lambda i: (0, 0)),        # class weights (invariant)
        ],
        out_specs=pl.BlockSpec((1, 8, 128), lambda i: (i, 0, 0)),
        compiler_params=pltpu.CompilerParams(
            dimension_semantics=("parallel",),
            vmem_limit_bytes=32 * 1024 * 1024,
        ),
    )(x, tgt, w)

    return jnp.sum(partials[:, 0, 0]) / jnp.float32(n)


def _ref_loss(x, target, cls_list, gamma=2.0):
    """Pure-JAX reference mirroring the PyTorch module."""
    w = _per_cls_weights(cls_list)
    xf = x.astype(jnp.float32)
    logp = jax.nn.log_softmax(xf, axis=-1)
    onehot = jax.nn.one_hot(target, xf.shape[1], dtype=jnp.float32)
    nll = -(onehot * logp).sum(-1)
    ce = w[target] * nll
    p = jnp.exp(-ce)
    return jnp.mean((1.0 - p) ** gamma * ce)


if __name__ == "__main__":
    key = jax.random.PRNGKey(0)
    kx, kt = jax.random.split(key)

    n, c = 8, 16
    cls_list = [50, 40, 30, 25, 20, 15, 12, 10, 8, 6, 5, 4, 3, 2, 2, 1]

    x = jax.random.normal(kx, (n, c), dtype=jnp.float32)
    target = jax.random.randint(kt, (n,), 0, c, dtype=jnp.int32)

    loss = class_balanced_focal_loss(x, target, cls_list, gamma=2.0)
    loss = jax.block_until_ready(loss)

    ref = _ref_loss(x, target, cls_list, gamma=2.0)
    assert jnp.allclose(loss, ref, rtol=1e-5, atol=1e-5), (loss, ref)

    print("KERNEL_OK")
</pallas_src>

<mosaic_0001>
module attributes {stable_mosaic.version = 11 : i64} {
  func.func @_cb_focal_kernel(%arg0: i32, %arg1: memref<8x16xf32, #tpu.memory_space<vmem>>, %arg2: memref<8x1xi32, #tpu.memory_space<vmem>>, %arg3: memref<1x16xf32, #tpu.memory_space<vmem>>, %arg4: memref<1x8x128xf32, #tpu.memory_space<vmem>>) attributes {dimension_semantics = [#tpu.dimension_semantics<parallel>], iteration_bounds = array<i64: 1>, scalar_prefetch = 0 : i64, scratch_operands = 0 : i64, tpu.core_type = #tpu.core_type<tc>, window_params = [{transform_indices = @transform_0, window_bounds = array<i64: 8, 16>}, {transform_indices = @transform_1, window_bounds = array<i64: 8, 1>}, {pipeline_mode = #tpu.pipeline_mode<synchronous>, transform_indices = @transform_2, window_bounds = array<i64: 1, 16>}, {transform_indices = @transform_3, window_bounds = array<i64: 1, 8, 128>}]} {
    %c0 = arith.constant 0 : index
    %c0_0 = arith.constant 0 : index
    %0 = vector.load %arg1[%c0, %c0_0] : memref<8x16xf32, #tpu.memory_space<vmem>>, vector<8x16xf32>
    %c0_1 = arith.constant 0 : index
    %c0_2 = arith.constant 0 : index
    %1 = vector.load %arg2[%c0_1, %c0_2] : memref<8x1xi32, #tpu.memory_space<vmem>>, vector<8x1xi32>
    %c0_3 = arith.constant 0 : index
    %c0_4 = arith.constant 0 : index
    %2 = vector.load %arg3[%c0_3, %c0_4] : memref<1x16xf32, #tpu.memory_space<vmem>>, vector<1x16xf32>
    %3 = tpu.iota {dimensions = array<i32: 1>} : vector<8x16xi32>
    %4 = vector.broadcast %1 : vector<8x1xi32> to vector<8x16xi32>
    %5 = arith.cmpi eq, %3, %4 : vector<8x16xi32>
    %6 = arith.extui %5 : vector<8x16xi1> to vector<8x16xi32>
    %7 = arith.sitofp %6 : vector<8x16xi32> to vector<8x16xf32>
    %8 = arith.mulf %7, %0 : vector<8x16xf32>
    %cst = arith.constant dense<0.000000e+00> : vector<8xf32>
    %9 = vector.multi_reduction <add>, %8, %cst [1] : vector<8x16xf32> to vector<8xf32>
    %10 = vector.shape_cast %9 : vector<8xf32> to vector<8x1xf32>
    %11 = vector.broadcast %2 : vector<1x16xf32> to vector<8x16xf32>
    %12 = arith.mulf %7, %11 : vector<8x16xf32>
    %cst_5 = arith.constant dense<0.000000e+00> : vector<8xf32>
    %13 = vector.multi_reduction <add>, %12, %cst_5 [1] : vector<8x16xf32> to vector<8xf32>
    %14 = vector.shape_cast %13 : vector<8xf32> to vector<8x1xf32>
    %cst_6 = arith.constant dense<0xFF800000> : vector<8xf32>
    %15 = vector.multi_reduction <maximumf>, %0, %cst_6 [1] : vector<8x16xf32> to vector<8xf32>
    %16 = vector.shape_cast %15 : vector<8xf32> to vector<8x1xf32>
    %17 = vector.broadcast %16 : vector<8x1xf32> to vector<8x16xf32>
    %18 = arith.subf %0, %17 : vector<8x16xf32>
    %19 = math.exp %18 : vector<8x16xf32>
    %cst_7 = arith.constant dense<0.000000e+00> : vector<8xf32>
    %20 = vector.multi_reduction <add>, %19, %cst_7 [1] : vector<8x16xf32> to vector<8xf32>
    %21 = vector.shape_cast %20 : vector<8xf32> to vector<8x1xf32>
    %22 = math.log %21 : vector<8x1xf32>
    %23 = arith.addf %16, %22 : vector<8x1xf32>
    %24 = arith.subf %23, %10 : vector<8x1xf32>
    %25 = arith.mulf %14, %24 : vector<8x1xf32>
    %cst_8 = arith.constant 0.000000e+00 : f32
    %26 = vector.broadcast %cst_8 : f32 to vector<8x1xf32>
    %27 = arith.subf %26, %25 : vector<8x1xf32>
    %28 = math.exp %27 : vector<8x1xf32>
    %cst_9 = arith.constant 1.000000e+00 : f32
    %29 = vector.broadcast %cst_9 : f32 to vector<8x1xf32>
    %30 = arith.subf %29, %28 : vector<8x1xf32>
    %cst_10 = arith.constant 1.000000e+00 : f32
    %31 = vector.broadcast %cst_10 : f32 to vector<8x1xf32>
    %32 = arith.mulf %31, %30 : vector<8x1xf32>
    %33 = arith.mulf %32, %30 : vector<8x1xf32>
    %34 = arith.mulf %33, %25 : vector<8x1xf32>
    %c8_i32 = arith.constant 8 : i32
    %35 = arith.muli %arg0, %c8_i32 : i32
    %36 = tpu.iota {dimensions = array<i32: 0>} : vector<8x1xi32>
    %37 = vector.broadcast %35 : i32 to vector<8x1xi32>
    %38 = arith.addi %37, %36 : vector<8x1xi32>
    %c8_i32_11 = arith.constant 8 : i32
    %39 = vector.broadcast %c8_i32_11 : i32 to vector<8x1xi32>
    %40 = arith.cmpi slt, %38, %39 : vector<8x1xi32>
    %cst_12 = arith.constant 0.000000e+00 : f32
    %41 = vector.broadcast %cst_12 : f32 to vector<8x1xf32>
    %42 = arith.select %40, %34, %41 : vector<8x1xi1>, vector<8x1xf32>
    %43 = vector.shape_cast %42 : vector<8x1xf32> to vector<1x8x1xf32>
    %cst_13 = arith.constant dense<0.000000e+00> : vector<1xf32>
    %44 = vector.multi_reduction <add>, %43, %cst_13 [1, 2] : vector<1x8x1xf32> to vector<1xf32>
    %45 = vector.shape_cast %44 : vector<1xf32> to vector<1x1x1xf32>
    %46 = vector.extract %45[0, 0, 0] : f32 from vector<1x1x1xf32>
    %47 = vector.broadcast %46 : f32 to vector<1x8x128xf32>
    %c0_14 = arith.constant 0 : index
    %c0_15 = arith.constant 0 : index
    %c0_16 = arith.constant 0 : index
    %48 = vector.load %arg4[%c0_14, %c0_15, %c0_16] : memref<1x8x128xf32, #tpu.memory_space<vmem>>, vector<1x8x128xf32>
    tpu.vector_store %arg4[%c0_14, %c0_15, %c0_16], %47 {strides = array<i32>} : memref<1x8x128xf32, #tpu.memory_space<vmem>>, vector<1x8x128xf32>,
    return
  }
  func.func @transform_0(%arg0: i32) -> (i32, i32) {
    %c0_i32 = arith.constant 0 : i32
    %c0_i32_0 = arith.constant 0 : i32
    return %arg0, %c0_i32 : i32, i32
  }
  func.func @transform_1(%arg0: i32) -> (i32, i32) {
    %c0_i32 = arith.constant 0 : i32
    %c0_i32_0 = arith.constant 0 : i32
    return %arg0, %c0_i32 : i32, i32
  }
  func.func @transform_2(%arg0: i32) -> (i32, i32) {
    %c0_i32 = arith.constant 0 : i32
    %c0_i32_0 = arith.constant 0 : i32
    %c0_i32_1 = arith.constant 0 : i32
    return %c0_i32, %c0_i32_0 : i32, i32
  }
  func.func @transform_3(%arg0: i32) -> (i32, i32, i32) {
    %c0_i32 = arith.constant 0 : i32
    %c0_i32_0 = arith.constant 0 : i32
    %c0_i32_1 = arith.constant 0 : i32
    return %arg0, %c0_i32, %c0_i32_0 : i32, i32, i32
  }
}

</mosaic_0001>

<bundles_post_ra>
// kernel: tpu_custom_call.1
= control target key start
LH: loop header
LB: loop body
LE: loop exit
PB: predicated region body
PF: predicated region fallthrough
CT: control target
= control target key end

     0   :  { %vm27_vm0 = vcmask 130048   ;;  %v134_v2 = vmov 0   ;;  %s173_s0 = inlined_call_operand.vmem [shape: f32[8,16], index: 0, kind: input, shape index: {}]   ;;  %s174_s1 = inlined_call_operand.vmem [shape: s32[8,1], index: 1, kind: input, shape index: {}]   ;;  %s175_s2 = inlined_call_operand.vmem [shape: f32[1,16], index: 2, kind: input, shape index: {}]   ;;  %s176_s3 = inlined_call_operand.hbm [shape: f32[1,8,128], index: 3, kind: output, shape index: {}]  }
   0x1   :  { %v15_v0 = vld [vmem:[%s173_s0] sm:$0xff]  ;;  %100 = vset.pattern.permute.xlu0 %v134_v2 }
   0x2   :  { %v38_v1 = vsel %vm27_vm0, %v15_v0, -inf }
   0x3   :  { %8 = vsyncpa [#allocation3], 0  ;;  %39 = vmax.xlane.f32.xlu0 %v38_v1  ;;  %v16_v3 = vld [vmem:[%s174_s1] sm:$0xff]  ;;  %v18_v9 = vlaneseq  ;;  %v135_v13 = vmov 0.0   ;;  %vm65_vm2 = vcmask 7168   ;;  %s136_s1 = smov [#allocation2]  }
   0x4   :  { %v101_v11 = vld [vmem:[%s175_s2] ss:$0 sm:$0xff]  ;;  %s83_s2 = sshll.u32 %s136_s1, 4  ;;  %s85_s19 = sshll.u32 %s176_s3, 4  ;;  %s84_s2 = int_to_ptr.vmem [resolvable:$true] %s83_s2  ;;  %s86_s19 = int_to_ptr.hbm [resolvable:$true] %s85_s19 }
   0x5   :  { %v19_v10 = vand.u32 127, %v18_v9 }
  0x17   :  { %21 = vperm.xlu0 %100, %v16_v3  }
  0x76   :  { %v40_v4 = vpop.xlane.xlu0 %39 }
  0x77   :  { %v41_v5 = vsub.f32 %v15_v0, %v40_v4 }
  0x79   :  { %v42_v6 = vmul.f32 1.442695, %v41_v5 }
  0x7b   :  { %102 = vpow2.f32 %v42_v6 }
  0x81   :  { %v103_v7 = vpop.eup %102 }
  0x82   :  { %v44_v8 = vsel %vm27_vm0, %v103_v7, 0.0 }
  0x83   :  { %45 = vadd.xlane.f32.xlu1 %v44_v8 }
  0x89   :  { %v22_v12 = vpop.permute.xlu0 %21 }
  0x8a   :  { %vm23_vm1 = vcmp.eq.s32.totalorder %v19_v10, %v22_v12 }
  0x8b   :  { %v94_v14 = vsel %vm23_vm1, 1.0, %v135_v13 }
  0x8c   :  { %v34_v15 = vmul.f32 %v101_v11, %v94_v14  ;;  %v26_v16 = vmul.f32 %v94_v14, %v15_v0 }
  0x8e   :  { %v35_v17 = vsel %vm27_vm0, %v34_v15, 0.0  ;;  %v28_v18 = vsel %vm27_vm0, %v26_v16, 0.0 }
  0x8f   :  { %36 = vadd.xlane.f32.xlu2 %v35_v17  ;;  %29 = vadd.xlane.f32.xlu1 %v28_v18 }
  0xf6   :  { %v46_v19 = vpop.xlane.xlu1 %45 }
  0xf7   :  { %104 = vlog2.f32 %v46_v19 }
  0xfd   :  { %v105_v20 = vpop.eup %104 }
  0xfe   :  { %v48_v21 = vmul.f32 0.6931472, %v105_v20 }
 0x100   :  { %v49_v22 = vadd.f32 %v48_v21, %v40_v4 }
 0x102   :  { %v30_v23 = vpop.xlane.xlu1 %29  ;;  %v37_v25 = vpop.xlane.xlu2 %36 }
 0x103   :  { %v50_v24 = vsub.f32 %v49_v22, %v30_v23 }
 0x105   :  { %v51_v26 = vmul.f32 %v50_v24, %v37_v25 }
 0x107   :  { %v52_v27 = vsub.f32 0.0, %v51_v26 }
 0x109   :  { %v53_v28 = vmul.f32 1.442695, %v52_v27 }
 0x10b   :  { %106 = vpow2.f32 %v53_v28 }
 0x111   :  { %v107_v29 = vpop.eup %106 }
 0x112   :  { %v55_v30 = vsub.f32 1.0, %v107_v29 }
 0x114   :  { %v56_v31 = vmul.f32 %v55_v30, %v55_v30 }
 0x116   :  { %v57_v32 = vmul.f32 %v56_v31, %v51_v26 }
 0x118   :  { %v66_v33 = vsel %vm65_vm2, %v57_v32, 0.0 }
 0x119   :  { %67 = vadd.xlane.f32.xlu2 %v66_v33 }
 0x18c   :  { %v68_v34 = vpop.xlane.xlu2 %67 }
 0x18d   :  { %v69_v35 = vrot.slane %v68_v34, 4 }
 0x18f   :  { %v70_v36 = vadd.f32 %v69_v35, %v68_v34 }
 0x191   :  { %v71_v37 = vrot.slane %v70_v36, 2 }
 0x193   :  { %v72_v38 = vadd.f32 %v71_v37, %v70_v36 }
 0x195   :  { %v73_v39 = vrot.slane %v72_v38, 1 }
 0x197   :  { %v74_v40 = vadd.f32 %v73_v39, %v72_v38 }
 0x199   :  { %95 = vpush %v74_v40 }
 0x1ca   :  { %s96_s20 = spop %95 }
 0x1cb   :  { %v76_v41 = vstv %s96_s20 }
 0x1cc   :  { %77 = vst [vmem:[#allocation2] sm:$0xff] %v76_v41 }
 0x1cd   :  { %88 = dma.vmem_to_hbm [thread:$0]  %s84_s2, 128, %s86_s19, [#allocation3]  }
 0x1ce   :  { %132 = dma.done.wait [#allocation3], 128  }
 0x1cf   :  { %133 = vsyncadd [#allocation3], 4294967168 }
 0x1d0   :  { %93 = vsyncpa [#allocation3], 1 }

</bundles_post_ra>
